<compile_context>
chip_gen: v7x
topology: tpu7x:2x2x1
jax: 0.10.0
libtpu: 0.0.40
codegen_flags: <defaults>
</compile_context>

<pallas_src>
import functools

import jax
import jax.numpy as jnp
from jax import lax
from jax.experimental import pallas as pl
from jax.experimental.pallas import tpu as pltpu

LANE = 128     # lane width (last dim alignment)
SUBLANE = 8    # f32 sublane count (second-to-last dim alignment)


# ----------------------------------------------------------------------------
# Padding / packing helpers (run once at parameter-prep time)
# ----------------------------------------------------------------------------
def _ceil_to(n, m):
    return ((n + m - 1) // m) * m


def _pad_to(a, shape):
    pads = [(0, s - d) for d, s in zip(a.shape, shape)]
    return jnp.pad(a, pads)


def _reorder_gates(w):
    """PyTorch gate order [i|f|g|o] -> [i|f|o|g] (contiguous, width H each), so
    the three sigmoid gates form one slice and tanh(g) is one slice."""
    i, f, g, o = jnp.split(w, 4, axis=-1)
    return jnp.concatenate([i, f, o, g], axis=-1)


def prepare_params(params, eps=1e-5):
    """Fold eval-mode BatchNorms into Linears, fold feFinal into the LSTM input
    projection, fold the combined bias into a padded row of w_comb, reorder the
    gates to [i|f|o|g], pad to lane-aligned tiles, cast MXU weights to bf16."""
    f32, bf16 = jnp.float32, jnp.bfloat16

    # --- fold BN1 into feFinal linear --------------------------------------
    s1 = params["bn1_g"] * lax.rsqrt(params["bn1_v"] + eps)            # (1, feH)
    w_fe = params["w_fe"] * s1                                          # (F, feH)
    b_fe = (params["b_fe"] - params["bn1_m"]) * s1 + params["bn1_b"]    # (1, feH)
    # --- fold feFinal into LSTM input projection (both are linear) ---------
    w_comb = w_fe @ params["w_ih"]                                      # (F, 4H)
    b_comb = b_fe @ params["w_ih"] + params["b_lstm"]                   # (1, 4H)
    # --- fold BN2 into classifier linear 1 ----------------------------------
    s2 = params["bn2_g"] * lax.rsqrt(params["bn2_v"] + eps)
    w_c1 = params["w_c1"] * s2
    b_c1 = (params["b_c1"] - params["bn2_m"]) * s2 + params["bn2_b"]

    F = w_comb.shape[0]
    H = params["w_hh"].shape[0]
    Hh, C = params["w_c2"].shape

    w_comb = _reorder_gates(w_comb)
    b_comb = _reorder_gates(b_comb)
    w_hh = _reorder_gates(params["w_hh"])

    G4 = 4 * H
    G4p = _ceil_to(G4, LANE)            # gates packed contiguously, pad total only
    Fp = _ceil_to(F + 1, LANE)          # +1: one padded row carries the folded bias
    Hhp = _ceil_to(Hh, LANE)
    Cp = _ceil_to(C, LANE)

    # Bias rides inside the matmul: row F of w_comb holds b_comb; the wrapper
    # sets x[..., F] = 1.0.  All other padded rows/cols are exactly zero, which
    # the padded-lane correctness of the recurrence relies on.
    w_comb_p = jnp.zeros((Fp, G4p), f32)
    w_comb_p = w_comb_p.at[:F, :G4].set(w_comb).at[F, :G4].set(b_comb[0])

    return {
        "w_comb": w_comb_p.astype(bf16),                     # (Fp, G4p)
        "w_hh":   _pad_to(w_hh, (H, G4p)).astype(bf16),      # (H,  G4p)  rows unpadded
        "w_c1":   _pad_to(w_c1, (H, Hhp)).astype(bf16),
        "b_c1":   _pad_to(b_c1, (1, Hhp)).astype(f32),
        "w_c2":   _pad_to(params["w_c2"], (Hhp, Cp)).astype(bf16),
        "b_c2":   _pad_to(params["b_c2"], (1, Cp)).astype(f32),
    }


# ----------------------------------------------------------------------------
# Fused kernel (one batch tile): input projection (all T) -> LSTM -> classifier
# ----------------------------------------------------------------------------
def apb_fused_kernel(x_ref, wcomb_ref, whh_ref, wc1_ref, bc1_ref, wc2_ref, bc2_ref,
                     o_ref, g_sc):
    T, TILE_B, Fp = x_ref.shape
    H, G4p = whh_ref.shape

    # (1) One MXU matmul for every timestep's gate pre-activation of this batch
    #     tile.  feFinal Linear+BN and the LSTM biases are folded into w_comb;
    #     the bias row pairs with the constant-1.0 column of x.  Cast to bf16
    #     happens here (hides under the MXU), scratch store is bf16.
    x = x_ref[...].reshape(T * TILE_B, Fp).astype(wcomb_ref.dtype)
    g_all = jnp.dot(x, wcomb_ref[...], preferred_element_type=jnp.float32)
    g_sc[...] = g_all.reshape(T, TILE_B, G4p).astype(g_sc.dtype)

    whh = whh_ref[...]                                       # (H, G4p) bf16

    def gate_math(gates):
        # packed order [i | f | o | g]: one sigmoid over 3H lanes, one tanh over H
        sg = jax.nn.sigmoid(gates[:, :3 * H])
        g = jnp.tanh(gates[:, 3 * H:4 * H])
        return sg[:, 0 * H:1 * H], sg[:, 1 * H:2 * H], sg[:, 2 * H:3 * H], g

    # (2) Serial recurrence, fully unrolled (T small + static -> LLO visibility).
    #     t = 0 peeled: h = c = 0, so the recurrent matmul and f*c term vanish.
    i, f, o, g = gate_math(g_sc[0].astype(jnp.float32))
    c = i * g
    h = o * jnp.tanh(c)
    for t in range(1, T):
        gates = g_sc[t].astype(jnp.float32) + jnp.dot(
            h.astype(whh.dtype), whh, preferred_element_type=jnp.float32)
        i, f, o, g = gate_math(gates)
        c = f * c + i * g
        h = o * jnp.tanh(c)

    # (3) Classifier head: Linear(+folded BN) -> ReLU -> Dropout(eval=id) -> Linear
    y = jnp.dot(h.astype(wc1_ref.dtype), wc1_ref[...],
                preferred_element_type=jnp.float32) + bc1_ref[...]
    y = jnp.maximum(y, 0.0)
    o_ref[...] = (jnp.dot(y.astype(wc2_ref.dtype), wc2_ref[...],
                          preferred_element_type=jnp.float32) + bc2_ref[...]
                  ).astype(o_ref.dtype)


def _apb_pallas(x_tm, prep, *, tile_b):
    T, Bp, Fp = x_tm.shape
    H, G4p = prep["w_hh"].shape
    Hhp, Cp = prep["w_c2"].shape

    weights = (prep["w_comb"], prep["w_hh"], prep["w_c1"], prep["b_c1"],
               prep["w_c2"], prep["b_c2"])

    def _resident(a):
        # whole weight = one block, same block for every grid step -> stays in VMEM
        return pl.BlockSpec(a.shape, lambda b: (0,) * a.ndim)

    flops = (2 * T * Bp * Fp * G4p            # input projection (incl. folded bias)
             + 2 * (T - 1) * Bp * H * G4p     # recurrent matmuls (t=0 peeled)
             + 2 * Bp * H * Hhp + 2 * Bp * Hhp * Cp)
    transcendentals = 5 * T * Bp * H          # 3 sigmoid + 2 tanh per hidden unit/step
    nbytes = (x_tm.size * x_tm.dtype.itemsize
              + sum(w.size * w.dtype.itemsize for w in weights)
              + Bp * Cp * 4)

    return pl.pallas_call(
        apb_fused_kernel,
        out_shape=jax.ShapeDtypeStruct((Bp, Cp), jnp.float32),
        grid=(Bp // tile_b,),
        in_specs=[pl.BlockSpec((T, tile_b, Fp), lambda b: (0, b, 0))]
                 + [_resident(w) for w in weights],
        out_specs=pl.BlockSpec((tile_b, Cp), lambda b: (b, 0)),
        scratch_shapes=[pltpu.VMEM((T, tile_b, G4p), jnp.bfloat16)],  # gate pre-acts
        compiler_params=pltpu.CompilerParams(
            dimension_semantics=("parallel",),          # batch tiles are independent
            vmem_limit_bytes=48 * 1024 * 1024),          # fits v7x's 64 MiB VMEM
        cost_estimate=pl.CostEstimate(flops=flops,
                                      transcendentals=transcendentals,
                                      bytes_accessed=nbytes),
    )(x_tm, *weights)


@functools.partial(jax.jit, static_argnames=("no_classes", "tile_b"))
def apb_forward(x, prep, *, no_classes, tile_b=8):
    B, T, F = x.shape
    Fp = prep["w_comb"].shape[0]
    Bp = _ceil_to(B, tile_b)
    # Time-major + pad batch/feature dims; x stays f32 (bf16 cast is in-kernel).
    # Column F carries the constant 1.0 that activates the bias row of w_comb.
    x_tm = jnp.transpose(x, (1, 0, 2))                       # (T, B, F)
    x_tm = jnp.pad(x_tm, ((0, 0), (0, Bp - B), (0, Fp - F)))
    x_tm = x_tm.at[:, :, F].set(1.0)
    out = _apb_pallas(x_tm, prep, tile_b=tile_b)             # (Bp, Cp) f32
    return out[:B, :no_classes]


# ----------------------------------------------------------------------------
# "PyTorch-like" parameters (unfused, f32) and a pure-JAX reference
# ----------------------------------------------------------------------------
def make_params(key, no_features, fe_hidden, lstm_hidden, no_classes):
    ks = jax.random.split(key, 12)
    s = 0.05
    H = lstm_hidden
    return {
        # feFinal: Linear(no_features -> fe_hidden), stored transposed (in, out)
        "w_fe": jax.random.normal(ks[0], (no_features, fe_hidden), jnp.float32) * s,
        "b_fe": jax.random.normal(ks[1], (1, fe_hidden), jnp.float32) * s,
        # BatchNorm1d(fe_hidden) eval-mode params / running stats
        "bn1_g": 1.0 + jax.random.normal(ks[2], (1, fe_hidden), jnp.float32) * s,
        "bn1_b": jax.random.normal(ks[3], (1, fe_hidden), jnp.float32) * s,
        "bn1_m": jax.random.normal(ks[4], (1, fe_hidden), jnp.float32) * s,
        "bn1_v": 1.0 + jnp.abs(jax.random.normal(ks[5], (1, fe_hidden), jnp.float32)) * s,
        # LSTM weights, stored transposed; gate order i,f,g,o; b = b_ih + b_hh
        "w_ih": jax.random.normal(ks[6], (fe_hidden, 4 * H), jnp.float32) * s,
        "w_hh": jax.random.normal(ks[7], (H, 4 * H), jnp.float32) * s,
        "b_lstm": jax.random.normal(ks[8], (1, 4 * H), jnp.float32) * s,
        # classifier: Linear(H -> H//2) + BN + ReLU + Dropout + Linear(H//2 -> C)
        "w_c1": jax.random.normal(ks[9], (H, H // 2), jnp.float32) * s,
        "b_c1": jax.random.normal(ks[10], (1, H // 2), jnp.float32) * s,
        "bn2_g": jnp.ones((1, H // 2), jnp.float32),
        "bn2_b": jnp.zeros((1, H // 2), jnp.float32),
        "bn2_m": jnp.zeros((1, H // 2), jnp.float32),
        "bn2_v": jnp.ones((1, H // 2), jnp.float32),
        "w_c2": jax.random.normal(ks[11], (H // 2, no_classes), jnp.float32) * s,
        "b_c2": jnp.zeros((1, no_classes), jnp.float32),
    }


def apb_reference(x, p, eps=1e-5):
    B, T, F = x.shape
    h1 = x.reshape(B * T, F) @ p["w_fe"] + p["b_fe"]
    s1 = p["bn1_g"] / jnp.sqrt(p["bn1_v"] + eps)
    h1 = (h1 - p["bn1_m"]) * s1 + p["bn1_b"]
    seq = h1.reshape(B, T, -1)
    H = p["w_hh"].shape[0]
    h = jnp.zeros((B, H), jnp.float32)
    c = jnp.zeros((B, H), jnp.float32)
    for t in range(T):
        gates = seq[:, t] @ p["w_ih"] + h @ p["w_hh"] + p["b_lstm"]
        i = jax.nn.sigmoid(gates[:, 0 * H:1 * H])
        f = jax.nn.sigmoid(gates[:, 1 * H:2 * H])
        g = jnp.tanh(gates[:, 2 * H:3 * H])
        o = jax.nn.sigmoid(gates[:, 3 * H:4 * H])
        c = f * c + i * g
        h = o * jnp.tanh(c)
    y = h @ p["w_c1"] + p["b_c1"]
    s2 = p["bn2_g"] / jnp.sqrt(p["bn2_v"] + eps)
    y = (y - p["bn2_m"]) * s2 + p["bn2_b"]
    y = jnp.maximum(y, 0.0)
    return y @ p["w_c2"] + p["b_c2"]


if __name__ == "__main__":
    # small shapes: batch=2, frames=8, features=64 (stand-in for resnet50's 2048),
    # feHidden=32, lstmHidden=32, noClasses=8
    B, T, F = 2, 8, 64
    FE_HIDDEN, LSTM_HIDDEN, NO_CLASSES = 32, 32, 8

    key = jax.random.PRNGKey(0)
    k_x, k_p = jax.random.split(key)
    x = jax.random.normal(k_x, (B, T, F), jnp.float32)
    params = make_params(k_p, F, FE_HIDDEN, LSTM_HIDDEN, NO_CLASSES)

    prep = prepare_params(params)          # fold BN/bias, repack gates, pad, bf16
    out = apb_forward(x, prep, no_classes=NO_CLASSES)
    out = jax.block_until_ready(out)

    assert out.shape == (B, NO_CLASSES), out.shape
    assert bool(jnp.all(jnp.isfinite(out)))

    ref = apb_reference(x, params)
    max_err = float(jnp.max(jnp.abs(out - ref)))
    assert max_err < 2e-2, f"max abs error vs reference: {max_err}"

    print("KERNEL_OK")
</pallas_src>

<mosaic_0001>
module attributes {stable_mosaic.version = 11 : i64} {
  func.func @apb_fused_kernel(%arg0: i32, %arg1: memref<8x8x128xf32, #tpu.memory_space<vmem>>, %arg2: memref<128x128xbf16, #tpu.memory_space<vmem>>, %arg3: memref<32x128xbf16, #tpu.memory_space<vmem>>, %arg4: memref<32x128xbf16, #tpu.memory_space<vmem>>, %arg5: memref<1x128xf32, #tpu.memory_space<vmem>>, %arg6: memref<128x128xbf16, #tpu.memory_space<vmem>>, %arg7: memref<1x128xf32, #tpu.memory_space<vmem>>, %arg8: memref<8x128xf32, #tpu.memory_space<vmem>>, %arg9: memref<8x8x128xbf16, #tpu.memory_space<vmem>>) attributes {dimension_semantics = [#tpu.dimension_semantics<parallel>], iteration_bounds = array<i64: 1>, scalar_prefetch = 0 : i64, scratch_operands = 1 : i64, tpu.core_type = #tpu.core_type<tc>, window_params = [{transform_indices = @transform_0, window_bounds = array<i64: 8, 8, 128>}, {pipeline_mode = #tpu.pipeline_mode<synchronous>, transform_indices = @transform_1, window_bounds = array<i64: 128, 128>}, {pipeline_mode = #tpu.pipeline_mode<synchronous>, transform_indices = @transform_2, window_bounds = array<i64: 32, 128>}, {pipeline_mode = #tpu.pipeline_mode<synchronous>, transform_indices = @transform_3, window_bounds = array<i64: 32, 128>}, {pipeline_mode = #tpu.pipeline_mode<synchronous>, transform_indices = @transform_4, window_bounds = array<i64: 1, 128>}, {pipeline_mode = #tpu.pipeline_mode<synchronous>, transform_indices = @transform_5, window_bounds = array<i64: 128, 128>}, {pipeline_mode = #tpu.pipeline_mode<synchronous>, transform_indices = @transform_6, window_bounds = array<i64: 1, 128>}, {transform_indices = @transform_7, window_bounds = array<i64: 8, 128>}]} {
    %c0 = arith.constant 0 : index
    %c0_0 = arith.constant 0 : index
    %c0_1 = arith.constant 0 : index
    %0 = vector.load %arg1[%c0, %c0_0, %c0_1] : memref<8x8x128xf32, #tpu.memory_space<vmem>>, vector<8x8x128xf32>
    %1 = vector.shape_cast %0 : vector<8x8x128xf32> to vector<64x128xf32>
    %2 = arith.truncf %1 : vector<64x128xf32> to vector<64x128xbf16>
    %c0_2 = arith.constant 0 : index
    %c0_3 = arith.constant 0 : index
    %3 = vector.load %arg2[%c0_2, %c0_3] : memref<128x128xbf16, #tpu.memory_space<vmem>>, vector<128x128xbf16>
    %cst = arith.constant dense<0.000000e+00> : vector<64x128xf32>
    %4 = tpu.matmul %2, %3, %cst {dimension_numbers = #tpu.dot_dimension_numbers<[1], [0], [0], [1], [0, 0, 1, 1], [], []>} : vector<64x128xbf16>, vector<128x128xbf16>, vector<64x128xf32> -> vector<64x128xf32>
    %5 = vector.shape_cast %4 : vector<64x128xf32> to vector<8x8x128xf32>
    %6 = arith.truncf %5 : vector<8x8x128xf32> to vector<8x8x128xbf16>
    %c0_4 = arith.constant 0 : index
    %c0_5 = arith.constant 0 : index
    %c0_6 = arith.constant 0 : index
    %7 = vector.load %arg9[%c0_4, %c0_5, %c0_6] : memref<8x8x128xbf16, #tpu.memory_space<vmem>>, vector<8x8x128xbf16>
    tpu.vector_store %arg9[%c0_4, %c0_5, %c0_6], %6 {strides = array<i32>} : memref<8x8x128xbf16, #tpu.memory_space<vmem>>, vector<8x8x128xbf16>,
    %c0_7 = arith.constant 0 : index
    %c0_8 = arith.constant 0 : index
    %8 = vector.load %arg3[%c0_7, %c0_8] : memref<32x128xbf16, #tpu.memory_space<vmem>>, vector<32x128xbf16>
    %c0_9 = arith.constant 0 : index
    %c0_10 = arith.constant 0 : index
    %c0_11 = arith.constant 0 : index
    %9 = vector.load %arg9[%c0_9, %c0_10, %c0_11] : memref<8x8x128xbf16, #tpu.memory_space<vmem>>, vector<1x8x128xbf16>
    %10 = vector.shape_cast %9 : vector<1x8x128xbf16> to vector<8x128xbf16>
    %11 = arith.extf %10 : vector<8x128xbf16> to vector<8x128xf32>
    %12 = vector.extract_strided_slice %11 {offsets = [0, 0], sizes = [8, 96], strides = [1, 1]} : vector<8x128xf32> to vector<8x96xf32>
    %13 = arith.negf %12 : vector<8x96xf32>
    %14 = math.exp %13 : vector<8x96xf32>
    %cst_12 = arith.constant 1.000000e+00 : f32
    %15 = vector.broadcast %cst_12 : f32 to vector<8x96xf32>
    %16 = arith.addf %15, %14 : vector<8x96xf32>
    %17 = arith.divf %15, %16 : vector<8x96xf32>
    %18 = vector.extract_strided_slice %11 {offsets = [0, 96], sizes = [8, 32], strides = [1, 1]} : vector<8x128xf32> to vector<8x32xf32>
    %19 = math.tanh %18 : vector<8x32xf32>
    %20 = vector.extract_strided_slice %17 {offsets = [0, 0], sizes = [8, 32], strides = [1, 1]} : vector<8x96xf32> to vector<8x32xf32>
    %21 = vector.extract_strided_slice %17 {offsets = [0, 64], sizes = [8, 32], strides = [1, 1]} : vector<8x96xf32> to vector<8x32xf32>
    %22 = arith.mulf %20, %19 : vector<8x32xf32>
    %23 = math.tanh %22 : vector<8x32xf32>
    %24 = arith.mulf %21, %23 : vector<8x32xf32>
    %c1 = arith.constant 1 : index
    %c0_13 = arith.constant 0 : index
    %c0_14 = arith.constant 0 : index
    %25 = vector.load %arg9[%c1, %c0_13, %c0_14] : memref<8x8x128xbf16, #tpu.memory_space<vmem>>, vector<1x8x128xbf16>
    %26 = vector.shape_cast %25 : vector<1x8x128xbf16> to vector<8x128xbf16>
    %27 = arith.extf %26 : vector<8x128xbf16> to vector<8x128xf32>
    %28 = arith.truncf %24 : vector<8x32xf32> to vector<8x32xbf16>
    %cst_15 = arith.constant dense<0.000000e+00> : vector<8x128xf32>
    %29 = tpu.matmul %28, %8, %cst_15 {dimension_numbers = #tpu.dot_dimension_numbers<[1], [0], [0], [1], [0, 0, 1, 1], [], []>} : vector<8x32xbf16>, vector<32x128xbf16>, vector<8x128xf32> -> vector<8x128xf32>
    %30 = arith.addf %27, %29 : vector<8x128xf32>
    %31 = vector.extract_strided_slice %30 {offsets = [0, 0], sizes = [8, 96], strides = [1, 1]} : vector<8x128xf32> to vector<8x96xf32>
    %32 = arith.negf %31 : vector<8x96xf32>
    %33 = math.exp %32 : vector<8x96xf32>
    %cst_16 = arith.constant 1.000000e+00 : f32
    %34 = vector.broadcast %cst_16 : f32 to vector<8x96xf32>
    %35 = arith.addf %34, %33 : vector<8x96xf32>
    %36 = arith.divf %34, %35 : vector<8x96xf32>
    %37 = vector.extract_strided_slice %30 {offsets = [0, 96], sizes = [8, 32], strides = [1, 1]} : vector<8x128xf32> to vector<8x32xf32>
    %38 = math.tanh %37 : vector<8x32xf32>
    %39 = vector.extract_strided_slice %36 {offsets = [0, 0], sizes = [8, 32], strides = [1, 1]} : vector<8x96xf32> to vector<8x32xf32>
    %40 = vector.extract_strided_slice %36 {offsets = [0, 32], sizes = [8, 32], strides = [1, 1]} : vector<8x96xf32> to vector<8x32xf32>
    %41 = vector.extract_strided_slice %36 {offsets = [0, 64], sizes = [8, 32], strides = [1, 1]} : vector<8x96xf32> to vector<8x32xf32>
    %42 = arith.mulf %40, %22 : vector<8x32xf32>
    %43 = arith.mulf %39, %38 : vector<8x32xf32>
    %44 = arith.addf %42, %43 : vector<8x32xf32>
    %45 = math.tanh %44 : vector<8x32xf32>
    %46 = arith.mulf %41, %45 : vector<8x32xf32>
    %c2 = arith.constant 2 : index
    %c0_17 = arith.constant 0 : index
    %c0_18 = arith.constant 0 : index
    %47 = vector.load %arg9[%c2, %c0_17, %c0_18] : memref<8x8x128xbf16, #tpu.memory_space<vmem>>, vector<1x8x128xbf16>
    %48 = vector.shape_cast %47 : vector<1x8x128xbf16> to vector<8x128xbf16>
    %49 = arith.extf %48 : vector<8x128xbf16> to vector<8x128xf32>
    %50 = arith.truncf %46 : vector<8x32xf32> to vector<8x32xbf16>
    %cst_19 = arith.constant dense<0.000000e+00> : vector<8x128xf32>
    %51 = tpu.matmul %50, %8, %cst_19 {dimension_numbers = #tpu.dot_dimension_numbers<[1], [0], [0], [1], [0, 0, 1, 1], [], []>} : vector<8x32xbf16>, vector<32x128xbf16>, vector<8x128xf32> -> vector<8x128xf32>
    %52 = arith.addf %49, %51 : vector<8x128xf32>
    %53 = vector.extract_strided_slice %52 {offsets = [0, 0], sizes = [8, 96], strides = [1, 1]} : vector<8x128xf32> to vector<8x96xf32>
    %54 = arith.negf %53 : vector<8x96xf32>
    %55 = math.exp %54 : vector<8x96xf32>
    %cst_20 = arith.constant 1.000000e+00 : f32
    %56 = vector.broadcast %cst_20 : f32 to vector<8x96xf32>
    %57 = arith.addf %56, %55 : vector<8x96xf32>
    %58 = arith.divf %56, %57 : vector<8x96xf32>
    %59 = vector.extract_strided_slice %52 {offsets = [0, 96], sizes = [8, 32], strides = [1, 1]} : vector<8x128xf32> to vector<8x32xf32>
    %60 = math.tanh %59 : vector<8x32xf32>
    %61 = vector.extract_strided_slice %58 {offsets = [0, 0], sizes = [8, 32], strides = [1, 1]} : vector<8x96xf32> to vector<8x32xf32>
    %62 = vector.extract_strided_slice %58 {offsets = [0, 32], sizes = [8, 32], strides = [1, 1]} : vector<8x96xf32> to vector<8x32xf32>
    %63 = vector.extract_strided_slice %58 {offsets = [0, 64], sizes = [8, 32], strides = [1, 1]} : vector<8x96xf32> to vector<8x32xf32>
    %64 = arith.mulf %62, %44 : vector<8x32xf32>
    %65 = arith.mulf %61, %60 : vector<8x32xf32>
    %66 = arith.addf %64, %65 : vector<8x32xf32>
    %67 = math.tanh %66 : vector<8x32xf32>
    %68 = arith.mulf %63, %67 : vector<8x32xf32>
    %c3 = arith.constant 3 : index
    %c0_21 = arith.constant 0 : index
    %c0_22 = arith.constant 0 : index
    %69 = vector.load %arg9[%c3, %c0_21, %c0_22] : memref<8x8x128xbf16, #tpu.memory_space<vmem>>, vector<1x8x128xbf16>
    %70 = vector.shape_cast %69 : vector<1x8x128xbf16> to vector<8x128xbf16>
    %71 = arith.extf %70 : vector<8x128xbf16> to vector<8x128xf32>
    %72 = arith.truncf %68 : vector<8x32xf32> to vector<8x32xbf16>
    %cst_23 = arith.constant dense<0.000000e+00> : vector<8x128xf32>
    %73 = tpu.matmul %72, %8, %cst_23 {dimension_numbers = #tpu.dot_dimension_numbers<[1], [0], [0], [1], [0, 0, 1, 1], [], []>} : vector<8x32xbf16>, vector<32x128xbf16>, vector<8x128xf32> -> vector<8x128xf32>
    %74 = arith.addf %71, %73 : vector<8x128xf32>
    %75 = vector.extract_strided_slice %74 {offsets = [0, 0], sizes = [8, 96], strides = [1, 1]} : vector<8x128xf32> to vector<8x96xf32>
    %76 = arith.negf %75 : vector<8x96xf32>
    %77 = math.exp %76 : vector<8x96xf32>
    %cst_24 = arith.constant 1.000000e+00 : f32
    %78 = vector.broadcast %cst_24 : f32 to vector<8x96xf32>
    %79 = arith.addf %78, %77 : vector<8x96xf32>
    %80 = arith.divf %78, %79 : vector<8x96xf32>
    %81 = vector.extract_strided_slice %74 {offsets = [0, 96], sizes = [8, 32], strides = [1, 1]} : vector<8x128xf32> to vector<8x32xf32>
    %82 = math.tanh %81 : vector<8x32xf32>
    %83 = vector.extract_strided_slice %80 {offsets = [0, 0], sizes = [8, 32], strides = [1, 1]} : vector<8x96xf32> to vector<8x32xf32>
    %84 = vector.extract_strided_slice %80 {offsets = [0, 32], sizes = [8, 32], strides = [1, 1]} : vector<8x96xf32> to vector<8x32xf32>
    %85 = vector.extract_strided_slice %80 {offsets = [0, 64], sizes = [8, 32], strides = [1, 1]} : vector<8x96xf32> to vector<8x32xf32>
    %86 = arith.mulf %84, %66 : vector<8x32xf32>
    %87 = arith.mulf %83, %82 : vector<8x32xf32>
    %88 = arith.addf %86, %87 : vector<8x32xf32>
    %89 = math.tanh %88 : vector<8x32xf32>
    %90 = arith.mulf %85, %89 : vector<8x32xf32>
    %c4 = arith.constant 4 : index
    %c0_25 = arith.constant 0 : index
    %c0_26 = arith.constant 0 : index
    %91 = vector.load %arg9[%c4, %c0_25, %c0_26] : memref<8x8x128xbf16, #tpu.memory_space<vmem>>, vector<1x8x128xbf16>
    %92 = vector.shape_cast %91 : vector<1x8x128xbf16> to vector<8x128xbf16>
    %93 = arith.extf %92 : vector<8x128xbf16> to vector<8x128xf32>
    %94 = arith.truncf %90 : vector<8x32xf32> to vector<8x32xbf16>
    %cst_27 = arith.constant dense<0.000000e+00> : vector<8x128xf32>
    %95 = tpu.matmul %94, %8, %cst_27 {dimension_numbers = #tpu.dot_dimension_numbers<[1], [0], [0], [1], [0, 0, 1, 1], [], []>} : vector<8x32xbf16>, vector<32x128xbf16>, vector<8x128xf32> -> vector<8x128xf32>
    %96 = arith.addf %93, %95 : vector<8x128xf32>
    %97 = vector.extract_strided_slice %96 {offsets = [0, 0], sizes = [8, 96], strides = [1, 1]} : vector<8x128xf32> to vector<8x96xf32>
    %98 = arith.negf %97 : vector<8x96xf32>
    %99 = math.exp %98 : vector<8x96xf32>
    %cst_28 = arith.constant 1.000000e+00 : f32
    %100 = vector.broadcast %cst_28 : f32 to vector<8x96xf32>
    %101 = arith.addf %100, %99 : vector<8x96xf32>
    %102 = arith.divf %100, %101 : vector<8x96xf32>
    %103 = vector.extract_strided_slice %96 {offsets = [0, 96], sizes = [8, 32], strides = [1, 1]} : vector<8x128xf32> to vector<8x32xf32>
    %104 = math.tanh %103 : vector<8x32xf32>
    %105 = vector.extract_strided_slice %102 {offsets = [0, 0], sizes = [8, 32], strides = [1, 1]} : vector<8x96xf32> to vector<8x32xf32>
    %106 = vector.extract_strided_slice %102 {offsets = [0, 32], sizes = [8, 32], strides = [1, 1]} : vector<8x96xf32> to vector<8x32xf32>
    %107 = vector.extract_strided_slice %102 {offsets = [0, 64], sizes = [8, 32], strides = [1, 1]} : vector<8x96xf32> to vector<8x32xf32>
    %108 = arith.mulf %106, %88 : vector<8x32xf32>
    %109 = arith.mulf %105, %104 : vector<8x32xf32>
    %110 = arith.addf %108, %109 : vector<8x32xf32>
    %111 = math.tanh %110 : vector<8x32xf32>
    %112 = arith.mulf %107, %111 : vector<8x32xf32>
    %c5 = arith.constant 5 : index
    %c0_29 = arith.constant 0 : index
    %c0_30 = arith.constant 0 : index
    %113 = vector.load %arg9[%c5, %c0_29, %c0_30] : memref<8x8x128xbf16, #tpu.memory_space<vmem>>, vector<1x8x128xbf16>
    %114 = vector.shape_cast %113 : vector<1x8x128xbf16> to vector<8x128xbf16>
    %115 = arith.extf %114 : vector<8x128xbf16> to vector<8x128xf32>
    %116 = arith.truncf %112 : vector<8x32xf32> to vector<8x32xbf16>
    %cst_31 = arith.constant dense<0.000000e+00> : vector<8x128xf32>
    %117 = tpu.matmul %116, %8, %cst_31 {dimension_numbers = #tpu.dot_dimension_numbers<[1], [0], [0], [1], [0, 0, 1, 1], [], []>} : vector<8x32xbf16>, vector<32x128xbf16>, vector<8x128xf32> -> vector<8x128xf32>
    %118 = arith.addf %115, %117 : vector<8x128xf32>
    %119 = vector.extract_strided_slice %118 {offsets = [0, 0], sizes = [8, 96], strides = [1, 1]} : vector<8x128xf32> to vector<8x96xf32>
    %120 = arith.negf %119 : vector<8x96xf32>
    %121 = math.exp %120 : vector<8x96xf32>
    %cst_32 = arith.constant 1.000000e+00 : f32
    %122 = vector.broadcast %cst_32 : f32 to vector<8x96xf32>
    %123 = arith.addf %122, %121 : vector<8x96xf32>
    %124 = arith.divf %122, %123 : vector<8x96xf32>
    %125 = vector.extract_strided_slice %118 {offsets = [0, 96], sizes = [8, 32], strides = [1, 1]} : vector<8x128xf32> to vector<8x32xf32>
    %126 = math.tanh %125 : vector<8x32xf32>
    %127 = vector.extract_strided_slice %124 {offsets = [0, 0], sizes = [8, 32], strides = [1, 1]} : vector<8x96xf32> to vector<8x32xf32>
    %128 = vector.extract_strided_slice %124 {offsets = [0, 32], sizes = [8, 32], strides = [1, 1]} : vector<8x96xf32> to vector<8x32xf32>
    %129 = vector.extract_strided_slice %124 {offsets = [0, 64], sizes = [8, 32], strides = [1, 1]} : vector<8x96xf32> to vector<8x32xf32>
    %130 = arith.mulf %128, %110 : vector<8x32xf32>
    %131 = arith.mulf %127, %126 : vector<8x32xf32>
    %132 = arith.addf %130, %131 : vector<8x32xf32>
    %133 = math.tanh %132 : vector<8x32xf32>
    %134 = arith.mulf %129, %133 : vector<8x32xf32>
    %c6 = arith.constant 6 : index
    %c0_33 = arith.constant 0 : index
    %c0_34 = arith.constant 0 : index
    %135 = vector.load %arg9[%c6, %c0_33, %c0_34] : memref<8x8x128xbf16, #tpu.memory_space<vmem>>, vector<1x8x128xbf16>
    %136 = vector.shape_cast %135 : vector<1x8x128xbf16> to vector<8x128xbf16>
    %137 = arith.extf %136 : vector<8x128xbf16> to vector<8x128xf32>
    %138 = arith.truncf %134 : vector<8x32xf32> to vector<8x32xbf16>
    %cst_35 = arith.constant dense<0.000000e+00> : vector<8x128xf32>
    %139 = tpu.matmul %138, %8, %cst_35 {dimension_numbers = #tpu.dot_dimension_numbers<[1], [0], [0], [1], [0, 0, 1, 1], [], []>} : vector<8x32xbf16>, vector<32x128xbf16>, vector<8x128xf32> -> vector<8x128xf32>
    %140 = arith.addf %137, %139 : vector<8x128xf32>
    %141 = vector.extract_strided_slice %140 {offsets = [0, 0], sizes = [8, 96], strides = [1, 1]} : vector<8x128xf32> to vector<8x96xf32>
    %142 = arith.negf %141 : vector<8x96xf32>
    %143 = math.exp %142 : vector<8x96xf32>
    %cst_36 = arith.constant 1.000000e+00 : f32
    %144 = vector.broadcast %cst_36 : f32 to vector<8x96xf32>
    %145 = arith.addf %144, %143 : vector<8x96xf32>
    %146 = arith.divf %144, %145 : vector<8x96xf32>
    %147 = vector.extract_strided_slice %140 {offsets = [0, 96], sizes = [8, 32], strides = [1, 1]} : vector<8x128xf32> to vector<8x32xf32>
    %148 = math.tanh %147 : vector<8x32xf32>
    %149 = vector.extract_strided_slice %146 {offsets = [0, 0], sizes = [8, 32], strides = [1, 1]} : vector<8x96xf32> to vector<8x32xf32>
    %150 = vector.extract_strided_slice %146 {offsets = [0, 32], sizes = [8, 32], strides = [1, 1]} : vector<8x96xf32> to vector<8x32xf32>
    %151 = vector.extract_strided_slice %146 {offsets = [0, 64], sizes = [8, 32], strides = [1, 1]} : vector<8x96xf32> to vector<8x32xf32>
    %152 = arith.mulf %150, %132 : vector<8x32xf32>
    %153 = arith.mulf %149, %148 : vector<8x32xf32>
    %154 = arith.addf %152, %153 : vector<8x32xf32>
    %155 = math.tanh %154 : vector<8x32xf32>
    %156 = arith.mulf %151, %155 : vector<8x32xf32>
    %c7 = arith.constant 7 : index
    %c0_37 = arith.constant 0 : index
    %c0_38 = arith.constant 0 : index
    %157 = vector.load %arg9[%c7, %c0_37, %c0_38] : memref<8x8x128xbf16, #tpu.memory_space<vmem>>, vector<1x8x128xbf16>
    %158 = vector.shape_cast %157 : vector<1x8x128xbf16> to vector<8x128xbf16>
    %159 = arith.extf %158 : vector<8x128xbf16> to vector<8x128xf32>
    %160 = arith.truncf %156 : vector<8x32xf32> to vector<8x32xbf16>
    %cst_39 = arith.constant dense<0.000000e+00> : vector<8x128xf32>
    %161 = tpu.matmul %160, %8, %cst_39 {dimension_numbers = #tpu.dot_dimension_numbers<[1], [0], [0], [1], [0, 0, 1, 1], [], []>} : vector<8x32xbf16>, vector<32x128xbf16>, vector<8x128xf32> -> vector<8x128xf32>
    %162 = arith.addf %159, %161 : vector<8x128xf32>
    %163 = vector.extract_strided_slice %162 {offsets = [0, 0], sizes = [8, 96], strides = [1, 1]} : vector<8x128xf32> to vector<8x96xf32>
    %164 = arith.negf %163 : vector<8x96xf32>
    %165 = math.exp %164 : vector<8x96xf32>
    %cst_40 = arith.constant 1.000000e+00 : f32
    %166 = vector.broadcast %cst_40 : f32 to vector<8x96xf32>
    %167 = arith.addf %166, %165 : vector<8x96xf32>
    %168 = arith.divf %166, %167 : vector<8x96xf32>
    %169 = vector.extract_strided_slice %162 {offsets = [0, 96], sizes = [8, 32], strides = [1, 1]} : vector<8x128xf32> to vector<8x32xf32>
    %170 = math.tanh %169 : vector<8x32xf32>
    %171 = vector.extract_strided_slice %168 {offsets = [0, 0], sizes = [8, 32], strides = [1, 1]} : vector<8x96xf32> to vector<8x32xf32>
    %172 = vector.extract_strided_slice %168 {offsets = [0, 32], sizes = [8, 32], strides = [1, 1]} : vector<8x96xf32> to vector<8x32xf32>
    %173 = vector.extract_strided_slice %168 {offsets = [0, 64], sizes = [8, 32], strides = [1, 1]} : vector<8x96xf32> to vector<8x32xf32>
    %174 = arith.mulf %172, %154 : vector<8x32xf32>
    %175 = arith.mulf %171, %170 : vector<8x32xf32>
    %176 = arith.addf %174, %175 : vector<8x32xf32>
    %177 = math.tanh %176 : vector<8x32xf32>
    %178 = arith.mulf %173, %177 : vector<8x32xf32>
    %179 = arith.truncf %178 : vector<8x32xf32> to vector<8x32xbf16>
    %c0_41 = arith.constant 0 : index
    %c0_42 = arith.constant 0 : index
    %180 = vector.load %arg4[%c0_41, %c0_42] : memref<32x128xbf16, #tpu.memory_space<vmem>>, vector<32x128xbf16>
    %cst_43 = arith.constant dense<0.000000e+00> : vector<8x128xf32>
    %181 = tpu.matmul %179, %180, %cst_43 {dimension_numbers = #tpu.dot_dimension_numbers<[1], [0], [0], [1], [0, 0, 1, 1], [], []>} : vector<8x32xbf16>, vector<32x128xbf16>, vector<8x128xf32> -> vector<8x128xf32>
    %c0_44 = arith.constant 0 : index
    %c0_45 = arith.constant 0 : index
    %182 = vector.load %arg5[%c0_44, %c0_45] : memref<1x128xf32, #tpu.memory_space<vmem>>, vector<1x128xf32>
    %183 = vector.broadcast %182 : vector<1x128xf32> to vector<8x128xf32>
    %184 = arith.addf %181, %183 : vector<8x128xf32>
    %cst_46 = arith.constant 0.000000e+00 : f32
    %185 = vector.broadcast %cst_46 : f32 to vector<8x128xf32>
    %186 = arith.maximumf %184, %185 : vector<8x128xf32>
    %187 = arith.truncf %186 : vector<8x128xf32> to vector<8x128xbf16>
    %c0_47 = arith.constant 0 : index
    %c0_48 = arith.constant 0 : index
    %188 = vector.load %arg6[%c0_47, %c0_48] : memref<128x128xbf16, #tpu.memory_space<vmem>>, vector<128x128xbf16>
    %cst_49 = arith.constant dense<0.000000e+00> : vector<8x128xf32>
    %189 = tpu.matmul %187, %188, %cst_49 {dimension_numbers = #tpu.dot_dimension_numbers<[1], [0], [0], [1], [0, 0, 1, 1], [], []>} : vector<8x128xbf16>, vector<128x128xbf16>, vector<8x128xf32> -> vector<8x128xf32>
    %c0_50 = arith.constant 0 : index
    %c0_51 = arith.constant 0 : index
    %190 = vector.load %arg7[%c0_50, %c0_51] : memref<1x128xf32, #tpu.memory_space<vmem>>, vector<1x128xf32>
    %191 = vector.broadcast %190 : vector<1x128xf32> to vector<8x128xf32>
    %192 = arith.addf %189, %191 : vector<8x128xf32>
    %c0_52 = arith.constant 0 : index
    %c0_53 = arith.constant 0 : index
    %193 = vector.load %arg8[%c0_52, %c0_53] : memref<8x128xf32, #tpu.memory_space<vmem>>, vector<8x128xf32>
    tpu.vector_store %arg8[%c0_52, %c0_53], %192 {strides = array<i32>} : memref<8x128xf32, #tpu.memory_space<vmem>>, vector<8x128xf32>,
    return
  }
  func.func @transform_0(%arg0: i32) -> (i32, i32, i32) {
    %c0_i32 = arith.constant 0 : i32
    %c0_i32_0 = arith.constant 0 : i32
    %c0_i32_1 = arith.constant 0 : i32
    return %c0_i32, %arg0, %c0_i32_0 : i32, i32, i32
  }
  func.func @transform_1(%arg0: i32) -> (i32, i32) {
    %c0_i32 = arith.constant 0 : i32
    %c0_i32_0 = arith.constant 0 : i32
    %c0_i32_1 = arith.constant 0 : i32
    return %c0_i32, %c0_i32_0 : i32, i32
  }
  func.func @transform_2(%arg0: i32) -> (i32, i32) {
    %c0_i32 = arith.constant 0 : i32
    %c0_i32_0 = arith.constant 0 : i32
    %c0_i32_1 = arith.constant 0 : i32
    return %c0_i32, %c0_i32_0 : i32, i32
  }
  func.func @transform_3(%arg0: i32) -> (i32, i32) {
    %c0_i32 = arith.constant 0 : i32
    %c0_i32_0 = arith.constant 0 : i32
    %c0_i32_1 = arith.constant 0 : i32
    return %c0_i32, %c0_i32_0 : i32, i32
  }
  func.func @transform_4(%arg0: i32) -> (i32, i32) {
    %c0_i32 = arith.constant 0 : i32
    %c0_i32_0 = arith.constant 0 : i32
    %c0_i32_1 = arith.constant 0 : i32
    return %c0_i32, %c0_i32_0 : i32, i32
  }
  func.func @transform_5(%arg0: i32) -> (i32, i32) {
    %c0_i32 = arith.constant 0 : i32
    %c0_i32_0 = arith.constant 0 : i32
    %c0_i32_1 = arith.constant 0 : i32
    return %c0_i32, %c0_i32_0 : i32, i32
  }
  func.func @transform_6(%arg0: i32) -> (i32, i32) {
    %c0_i32 = arith.constant 0 : i32
    %c0_i32_0 = arith.constant 0 : i32
    %c0_i32_1 = arith.constant 0 : i32
    return %c0_i32, %c0_i32_0 : i32, i32
  }
  func.func @transform_7(%arg0: i32) -> (i32, i32) {
    %c0_i32 = arith.constant 0 : i32
    %c0_i32_0 = arith.constant 0 : i32
    return %arg0, %c0_i32 : i32, i32
  }
}

</mosaic_0001>

<bundles_post_ra>
// kernel: apb_forward.1
= control target key start
LH: loop header
LB: loop body
LE: loop exit
PB: predicated region body
PF: predicated region fallthrough
CT: control target
= control target key end

     0   :  { %v1241_v40 = vmov 0.0   ;;  %vm1242_vm0 = vmmov 0   ;;  %s1243_s13 = smov 64   ;;  %vm227_vm1 = vcmask 261120   ;;  %s1477_s1 = inlined_call_operand.vmem [shape: bf16[128,128], index: 1, kind: input, shape index: {}]   ;;  %s1478_s0 = inlined_call_operand.vmem [shape: f32[8,8,128], index: 0, kind: input, shape index: {}]   ;;  %s1479_s2 = inlined_call_operand.vmem [shape: bf16[32,128], index: 2, kind: input, shape index: {}]   ;;  %s1480_s3 = inlined_call_operand.vmem [shape: bf16[32,128], index: 3, kind: input, shape index: {}]   ;;  %s1481_s5 = inlined_call_operand.vmem [shape: bf16[128,128], index: 5, kind: input, shape index: {}]   ;;  %s1482_s4 = inlined_call_operand.vmem [shape: f32[1,128], index: 4, kind: input, shape index: {}]   ;;  %s1483_s6 = inlined_call_operand.vmem [shape: f32[1,128], index: 6, kind: input, shape index: {}]   ;;  %s1484_s7 = inlined_call_operand.vmem [shape: f32[8,128], index: 7, kind: output, shape index: {}]  }
   0x1   :  { %v1156_v0 = vld [vmem:[%s1477_s1] sm:$0xff]   ;;  %v1157_v1 = vld [vmem:[%s1477_s1 + $0x8] sm:$0xff]   ;;  %v1158_v2 = vld [vmem:[%s1477_s1 + $0x10] sm:$0xff]   ;;  %1076 = vmatprep.subr.bf16.mxu1 %v1241_v40  ;;  %1080 = vmatprep.mubr.msk.bf16.mxu1 %vm1242_vm0, %v1241_v40 }
   0x2   :  { %1044 = vmatprep.subr.bf16.mxu0 %v1156_v0  ;;  %v1159_v3 = vld [vmem:[%s1477_s1 + $0x18] sm:$0xff]   ;;  %v27_v4 = vld [vmem:[%s1478_s0] sm:$0xff]  ;;  %v28_v5 = vld [vmem:[%s1478_s0 + $0x8] sm:$0xff] }
   0x3   :  { %1045 = vmatpush3.bf16.msra.mxu0 %v1156_v0  ;;  %v35_v6 = vpack.c.bf16 %v28_v5, %v27_v4  ;;  %v1160_v7 = vld [vmem:[%s1477_s1 + $0x20] sm:$0xff]   ;;  %v1161_v8 = vld [vmem:[%s1477_s1 + $0x28] sm:$0xff]   ;;  %v1162_v9 = vld [vmem:[%s1477_s1 + $0x30] sm:$0xff]  }
   0x4   :  { %1046 = vmatprep.subr.bf16.mxu0 %v1157_v1  ;;  %v1163_v10 = vld [vmem:[%s1477_s1 + $0x38] sm:$0xff]   ;;  %v29_v11 = vld [vmem:[%s1478_s0 + $0x10] sm:$0xff]  ;;  %v31_v13 = vld [vmem:[%s1478_s0 + $0x20] sm:$0xff] }
   0x5   :  { %1060 = vmatprep.mubr.bf16.mxu0 %v35_v6  ;;  %v30_v12 = vld [vmem:[%s1478_s0 + $0x18] sm:$0xff]  ;;  %v32_v14 = vld [vmem:[%s1478_s0 + $0x28] sm:$0xff]  ;;  %v33_v17 = vld [vmem:[%s1478_s0 + $0x30] sm:$0xff] }
   0x6   :  { %v36_v15 = vpack.c.bf16 %v30_v12, %v29_v11  ;;  %v37_v16 = vpack.c.bf16 %v32_v14, %v31_v13  ;;  %v34_v18 = vld [vmem:[%s1478_s0 + $0x38] sm:$0xff]  ;;  %s1240_s0 = smov 32   ;;  %v1337_v41 = vld [vmem:[%s1479_s2] sm:$0xff]   ;;  %v1348_v42 = vld [vmem:[%s1479_s2 + $0x8] sm:$0xff]  }
   0x7   :  { %1047 = vmatpush3.bf16.msra.mxu0 %v1157_v1  ;;  %v38_v19 = vpack.c.bf16 %v34_v18, %v33_v17  ;;  %1077 = vmatpush3.bf16.msra.mxu1 %v1337_v41 }
   0x8   :  { %1048 = vmatprep.subr.bf16.mxu0 %v1158_v2  ;;  %1078 = vmatprep.subr.bf16.mxu1 %v1241_v40 }
   0xb   :  { %1049 = vmatpush3.bf16.msra.mxu0 %v1158_v2  ;;  %1079 = vmatpush3.bf16.msra.mxu1 %v1348_v42 }
   0xc   :  { %1050 = vmatprep.subr.bf16.mxu0 %v1159_v3  ;;  %1084 = vmatprep.subr.bf16.mxu1 %v1241_v40 }
   0xf   :  { %1051 = vmatpush3.bf16.msra.mxu0 %v1159_v3 }
  0x10   :  { %1052 = vmatprep.subr.bf16.mxu0 %v1160_v7 }
  0x13   :  { %1053 = vmatpush3.bf16.msra.mxu0 %v1160_v7 }
  0x14   :  { %1054 = vmatprep.subr.bf16.mxu0 %v1161_v8 }
  0x17   :  { %1055 = vmatpush3.bf16.msra.mxu0 %v1161_v8 }
  0x18   :  { %1056 = vmatprep.subr.bf16.mxu0 %v1162_v9 }
  0x1b   :  { %1057 = vmatpush3.bf16.msra.mxu0 %v1162_v9 }
  0x1c   :  { %1058 = vmatprep.subr.bf16.mxu0 %v1163_v10 }
  0x1f   :  { %1059 = vmatpush3.bf16.msra.mxu0 %v1163_v10 }
  0x20   :  { %1068 = vmatprep.subr.bf16.mxu0 %v1241_v40 }
  0x22   :  { %1061 = vmatmul.mubr.bf16.vlgmr.msra.gmra.mrb[0].mxu0 %v36_v15 }
  0x23   :  { %1064 = vmatprep.mubr.bf16.mxu0 %v37_v16  ;;  %1069 = vmatpush3.bf16.msra.mxu0 %v1337_v41 }
  0x24   :  { %1070 = vmatprep.subr.bf16.mxu0 %v1241_v40 }
  0x27   :  { %1071 = vmatpush3.bf16.msra.mxu0 %v1348_v42 }
  0x28   :  { %1108 = vmatprep.subr.bf16.mxu0 %v1241_v40 }
  0x2a   :  { %1065 = vmatmul.mubr.bf16.gmra.mrb[4].mxu0 %v38_v19 }
  0x2b   :  { %1072 = vmatprep.mubr.msk.bf16.mxu0 %vm1242_vm0, %v1241_v40 }
  0xf5   :  { %v1062_v20 = vpop.f32.mrb[0].mxu0 }
  0xf6   :  { %v137_v21 = vpop.f32.mrb[1].mxu0 }
  0xf7   :  { %v1063_v22 = vpop.f32.mrb[2].mxu0 }
  0xf8   :  { %v984_v23 = vpack.c.bf16 %v1063_v22, %v1062_v20  ;;  %v140_v24 = vpop.f32.mrb[3].mxu0 }
  0xf9   :  { %v979_v25 = vpack.c.bf16 %v140_v24, %v137_v21 }
  0xfa   :  { %996 = vst [vmem:[#allocation2 + $0x8] sm:$0xff] %v984_v23  }
  0xfb   :  { %980 = vst [vmem:[#allocation2] sm:$0xff] %v979_v25  }
  0xfd   :  { %v1066_v26 = vpop.f32.mrb[4].mxu0 }
  0xfe   :  { %v153_v27 = vpop.f32.mrb[5].mxu0 }
  0xff   :  { %v1067_v28 = vpop.f32.mrb[6].mxu0 }
 0x100   :  { %v156_v29 = vpop.f32.mrb[7].mxu0  ;;  %v994_v44 = vpack.c.bf16 %v1067_v28, %v1066_v26 }
 0x101   :  { %v989_v30 = vpack.c.bf16 %v156_v29, %v153_v27 }
 0x102   :  { %v188_v31 = vld [vmem:[#allocation2] sm:$0xf]  ;;  %998 = vst [vmem:[#allocation2 + $0x18] sm:$0xff] %v994_v44   ;;  %v209_v49 = vld [vmem:[#allocation2 + $0x4] sm:$0xff]  }
 0x103   :  { %v189_v32 = vunpack.c.l.bf16 %v188_v31  ;;  %997 = vst [vmem:[#allocation2 + $0x10] sm:$0xff] %v989_v30   ;;  %v210_v50 = vunpack.c.l.bf16 %v209_v49  ;;  %v302_v8 = vunpack.c.h.bf16 %v209_v49 }
 0x105   :  { %1176 = vtanh.f32 %v189_v32  ;;  %v946_v34 = vmul.f32 -1.442695, %v189_v32 }
 0x107   :  { %1178 = vpow2.f32 %v946_v34 }
 0x10a   :  { %v376_v29 = vld [vmem:[#allocation2 + $0xc] sm:$0xff]  }
 0x10b   :  { %v377_v30 = vunpack.c.l.bf16 %v376_v29 }
 0x10f   :  { %v1177_v33 = vpop.eup %1176 }
 0x110   :  { %198 = vrot.lane.b32.xlu0 %v1177_v33, %s1240_s0 }
 0x111   :  { %v1179_v35 = vpop.eup %1178 }
 0x112   :  { %v193_v36 = vadd.f32 1.0, %v1179_v35 }
 0x114   :  { %1180 = vrcp.f32 %v193_v36 }
 0x11e   :  { %v1181_v37 = vpop.eup %1180 }
 0x182   :  { %v199_v38 = vpop.permute.xlu0 %198 }
 0x183   :  { %v201_v39 = vmul.f32 %v1181_v37, %v199_v38 }
 0x185   :  { %1182 = vtanh.f32 %v201_v39 }
 0x18f   :  { %v1183_v43 = vpop.eup %1182 }
 0x190   :  { %204 = vrot.lane.b32.xlu0 %v1183_v43, %s1243_s13 }
 0x194   :  { %280 = vrot.lane.b32.xlu0 %v201_v39, %s1240_s0 }
 0x202   :  { %v205_v45 = vpop.permute.xlu0 %204 }
 0x203   :  { %v207_v46 = vmul.f32 %v1181_v37, %v205_v45 }
 0x205   :  { %v211_v47 = vpack.c.bf16 %v207_v46, %v207_v46 }
 0x206   :  { %v281_v63 = vpop.permute.xlu0 %280 }
 0x207   :  { %213 = vrot.lane.b32.xlu1 %v211_v47, %s1243_s13 }
 0x279   :  { %v214_v48 = vpop.permute.xlu1 %213 }
 0x27a   :  { %1073 = vmatmul.mubr.msk.bf16.vlgmr.msra.gmra.mrb[8].mxu0 %vm227_vm1, %v214_v48 }
 0x27b   :  { %1109 = vmatpush3.bf16.msra.mxu0 %v1337_v41  ;;  %1112 = vmatprep.mubr.msk.bf16.mxu0 %vm1242_vm0, %v1241_v40 }
 0x27c   :  { %1110 = vmatprep.subr.bf16.mxu0 %v1241_v40 }
 0x27f   :  { %1111 = vmatpush3.bf16.msra.mxu0 %v1348_v42 }
 0x280   :  { %1124 = vmatprep.subr.bf16.mxu0 %v1241_v40 }
 0x34d   :  { %v265_v51 = vpop.f32.mrb[8].mxu0 }
 0x34e   :  { %v271_v52 = vadd.f32 %v265_v51, %v210_v50  ;;  %v1074_v53 = vpop.f32.mrb[9].mxu0 }
 0x34f   :  { %v268_v54 = vpop.f32.mrb[10].mxu0 }
 0x350   :  { %1184 = vtanh.f32 %v271_v52  ;;  %v1075_v55 = vpop.f32.mrb[11].mxu0  ;;  %v950_v57 = vmul.f32 -1.442695, %v271_v52  ;;  %v452_v54 = vunpack.c.h.bf16 %v376_v29 }
 0x352   :  { %1186 = vpow2.f32 %v950_v57 }
 0x35a   :  { %v1185_v56 = vpop.eup %1184 }
 0x35b   :  { %285 = vrot.lane.b32.xlu1 %v1185_v56, %s1240_s0 }
 0x35c   :  { %v1187_v58 = vpop.eup %1186 }
 0x35d   :  { %v275_v59 = vadd.f32 1.0, %v1187_v58 }
 0x35f   :  { %1188 = vrcp.f32 %v275_v59 }
 0x369   :  { %v1189_v60 = vpop.eup %1188 }
 0x36a   :  { %v283_v0 = vmul.f32 %v1189_v60, %v281_v63 }
 0x3cd   :  { %v286_v61 = vpop.permute.xlu1 %285 }
 0x3ce   :  { %v288_v62 = vmul.f32 %v1189_v60, %v286_v61 }
 0x3d0   :  { %290 = vrot.lane.b32.xlu1 %v288_v62, %s1240_s0 }
 0x442   :  { %v291_v1 = vpop.permute.xlu1 %290 }
 0x443   :  { %v293_v2 = vadd.f32 %v291_v1, %v283_v0 }
 0x445   :  { %1190 = vtanh.f32 %v293_v2 }
 0x44f   :  { %v1191_v3 = vpop.eup %1190 }
 0x450   :  { %296 = vrot.lane.b32.xlu0 %v1191_v3, %s1240_s0 }
 0x4c2   :  { %v297_v4 = vpop.permute.xlu0 %296 }
 0x4c3   :  { %v299_v5 = vmul.f32 %v1189_v60, %v297_v4 }
 0x4c5   :  { %v303_v6 = vpack.c.bf16 %v299_v5, %v299_v5 }
 0x4c7   :  { %305 = vrot.lane.b32.xlu1 %v303_v6, %s1243_s13 }
 0x539   :  { %v306_v7 = vpop.permute.xlu1 %305 }
 0x53a   :  { %1081 = vmatmul.mubr.msk.bf16.vlgmr.msra.gmra.mrb[0].mxu1 %vm227_vm1, %v306_v7 }
 0x53b   :  { %1085 = vmatpush3.bf16.msra.mxu1 %v1337_v41  ;;  %1088 = vmatprep.mubr.msk.bf16.mxu1 %vm1242_vm0, %v1241_v40 }
 0x53c   :  { %1086 = vmatprep.subr.bf16.mxu1 %v1241_v40 }
 0x53f   :  { %1087 = vmatpush3.bf16.msra.mxu1 %v1348_v42 }
 0x540   :  { %1092 = vmatprep.subr.bf16.mxu1 %v1241_v40 }
 0x60d   :  { %v344_v9 = vpop.f32.mrb[0].mxu1 }
 0x60e   :  { %v350_v10 = vadd.f32 %v344_v9, %v302_v8  ;;  %v1082_v11 = vpop.f32.mrb[1].mxu1 }
 0x60f   :  { %v347_v12 = vpop.f32.mrb[2].mxu1  ;;  %v526_v11 = vld [vmem:[#allocation2 + $0x14] sm:$0xff]  }
 0x610   :  { %1192 = vtanh.f32 %v350_v10  ;;  %v1083_v13 = vpop.f32.mrb[3].mxu1  ;;  %v952_v15 = vmul.f32 -1.442695, %v350_v10  ;;  %v527_v12 = vunpack.c.l.bf16 %v526_v11 }
 0x612   :  { %1194 = vpow2.f32 %v952_v15 }
 0x61a   :  { %v1193_v14 = vpop.eup %1192 }
 0x61b   :  { %360 = vrot.lane.b32.xlu0 %v1193_v14, %s1240_s0 }
 0x61c   :  { %v1195_v16 = vpop.eup %1194 }
 0x61d   :  { %v354_v17 = vadd.f32 1.0, %v1195_v16 }
 0x61f   :  { %1196 = vrcp.f32 %v354_v17 }
 0x629   :  { %v1197_v18 = vpop.eup %1196 }
 0x62a   :  { %v358_v21 = vmul.f32 %v1197_v18, %v293_v2 }
 0x68d   :  { %v361_v19 = vpop.permute.xlu0 %360 }
 0x68e   :  { %v363_v20 = vmul.f32 %v1197_v18, %v361_v19 }
 0x690   :  { %365 = vrot.lane.b32.xlu1 %v363_v20, %s1240_s0 }
 0x702   :  { %v366_v22 = vpop.permute.xlu1 %365 }
 0x703   :  { %v368_v23 = vadd.f32 %v366_v22, %v358_v21 }
 0x705   :  { %1198 = vtanh.f32 %v368_v23 }
 0x70f   :  { %v1199_v24 = vpop.eup %1198 }
 0x710   :  { %371 = vrot.lane.b32.xlu0 %v1199_v24, %s1240_s0 }
 0x782   :  { %v372_v25 = vpop.permute.xlu0 %371 }
 0x783   :  { %v374_v26 = vmul.f32 %v1197_v18, %v372_v25 }
 0x785   :  { %v378_v27 = vpack.c.bf16 %v374_v26, %v374_v26 }
 0x787   :  { %380 = vrot.lane.b32.xlu1 %v378_v27, %s1243_s13 }
 0x7f9   :  { %v381_v28 = vpop.permute.xlu1 %380 }
 0x7fa   :  { %1089 = vmatmul.mubr.msk.bf16.vlgmr.msra.gmra.mrb[4].mxu1 %vm227_vm1, %v381_v28 }
 0x7fb   :  { %1093 = vmatpush3.bf16.msra.mxu1 %v1337_v41  ;;  %1096 = vmatprep.mubr.msk.bf16.mxu1 %vm1242_vm0, %v1241_v40 }
 0x7fc   :  { %1094 = vmatprep.subr.bf16.mxu1 %v1241_v40 }
 0x7ff   :  { %1095 = vmatpush3.bf16.msra.mxu1 %v1348_v42 }
 0x800   :  { %1100 = vmatprep.subr.bf16.mxu1 %v1241_v40 }
 0x8cd   :  { %v419_v31 = vpop.f32.mrb[4].mxu1 }
 0x8ce   :  { %v425_v32 = vadd.f32 %v419_v31, %v377_v30  ;;  %v1090_v33 = vpop.f32.mrb[5].mxu1  ;;  %v602_v31 = vunpack.c.h.bf16 %v526_v11  ;;  %v1168_v11 = vld [vmem:[%s1481_s5] sm:$0xff]  }
 0x8cf   :  { %v422_v34 = vpop.f32.mrb[6].mxu1 }
 0x8d0   :  { %1200 = vtanh.f32 %v425_v32  ;;  %v1091_v35 = vpop.f32.mrb[7].mxu1  ;;  %v954_v37 = vmul.f32 -1.442695, %v425_v32 }
 0x8d2   :  { %1202 = vpow2.f32 %v954_v37 }
 0x8da   :  { %v1201_v36 = vpop.eup %1200 }
 0x8db   :  { %435 = vrot.lane.b32.xlu0 %v1201_v36, %s1240_s0 }
 0x8dc   :  { %v1203_v38 = vpop.eup %1202 }
 0x8dd   :  { %v429_v39 = vadd.f32 1.0, %v1203_v38 }
 0x8df   :  { %1204 = vrcp.f32 %v429_v39 }
 0x8e9   :  { %v1205_v43 = vpop.eup %1204 }
 0x8ea   :  { %v433_v46 = vmul.f32 %v1205_v43, %v368_v23 }
 0x94d   :  { %v436_v44 = vpop.permute.xlu0 %435 }
 0x94e   :  { %v438_v45 = vmul.f32 %v1205_v43, %v436_v44 }
 0x950   :  { %440 = vrot.lane.b32.xlu1 %v438_v45, %s1240_s0 }
 0x9c2   :  { %v441_v47 = vpop.permute.xlu1 %440 }
 0x9c3   :  { %v443_v48 = vadd.f32 %v441_v47, %v433_v46 }
 0x9c5   :  { %1206 = vtanh.f32 %v443_v48 }
 0x9cf   :  { %v1207_v49 = vpop.eup %1206 }
 0x9d0   :  { %446 = vrot.lane.b32.xlu0 %v1207_v49, %s1240_s0 }
 0xa42   :  { %v447_v50 = vpop.permute.xlu0 %446 }
 0xa43   :  { %v449_v51 = vmul.f32 %v1205_v43, %v447_v50 }
 0xa45   :  { %v453_v52 = vpack.c.bf16 %v449_v51, %v449_v51 }
 0xa47   :  { %455 = vrot.lane.b32.xlu1 %v453_v52, %s1243_s13 }
 0xab9   :  { %v456_v53 = vpop.permute.xlu1 %455 }
 0xaba   :  { %1097 = vmatmul.mubr.msk.bf16.vlgmr.msra.gmra.mrb[8].mxu1 %vm227_vm1, %v456_v53 }
 0xabb   :  { %1101 = vmatpush3.bf16.msra.mxu1 %v1337_v41  ;;  %1104 = vmatprep.mubr.msk.bf16.mxu1 %vm1242_vm0, %v1241_v40 }
 0xabc   :  { %1102 = vmatprep.subr.bf16.mxu1 %v1241_v40 }
 0xabf   :  { %1103 = vmatpush3.bf16.msra.mxu1 %v1348_v42 }
 0xac0   :  { %1116 = vmatprep.subr.bf16.mxu1 %v1241_v40 }
 0xb8d   :  { %v494_v55 = vpop.f32.mrb[8].mxu1 }
 0xb8e   :  { %v500_v56 = vadd.f32 %v494_v55, %v452_v54  ;;  %v1098_v57 = vpop.f32.mrb[9].mxu1  ;;  %v676_v55 = vld [vmem:[#allocation2 + $0x1c] sm:$0xf] }
 0xb8f   :  { %v497_v58 = vpop.f32.mrb[10].mxu1 }
 0xb90   :  { %1208 = vtanh.f32 %v500_v56  ;;  %v1099_v59 = vpop.f32.mrb[11].mxu1  ;;  %v956_v61 = vmul.f32 -1.442695, %v500_v56  ;;  %v677_v56 = vunpack.c.l.bf16 %v676_v55 }
 0xb92   :  { %1210 = vpow2.f32 %v956_v61 }
 0xb9a   :  { %v1209_v60 = vpop.eup %1208 }
 0xb9b   :  { %510 = vrot.lane.b32.xlu0 %v1209_v60, %s1240_s0 }
 0xb9c   :  { %v1211_v62 = vpop.eup %1210 }
 0xb9d   :  { %v504_v63 = vadd.f32 1.0, %v1211_v62 }
 0xb9f   :  { %1212 = vrcp.f32 %v504_v63 }
 0xba9   :  { %v1213_v0 = vpop.eup %1212 }
 0xbaa   :  { %v508_v3 = vmul.f32 %v1213_v0, %v443_v48 }
 0xc0d   :  { %v511_v1 = vpop.permute.xlu0 %510 }
 0xc0e   :  { %v513_v2 = vmul.f32 %v1213_v0, %v511_v1 }
 0xc10   :  { %515 = vrot.lane.b32.xlu1 %v513_v2, %s1240_s0 }
 0xc82   :  { %v516_v4 = vpop.permute.xlu1 %515 }
 0xc83   :  { %v518_v5 = vadd.f32 %v516_v4, %v508_v3 }
 0xc85   :  { %1214 = vtanh.f32 %v518_v5 }
 0xc8f   :  { %v1215_v6 = vpop.eup %1214 }
 0xc90   :  { %521 = vrot.lane.b32.xlu0 %v1215_v6, %s1240_s0 }
 0xd02   :  { %v522_v7 = vpop.permute.xlu0 %521 }
 0xd03   :  { %v524_v8 = vmul.f32 %v1213_v0, %v522_v7 }
 0xd05   :  { %v528_v9 = vpack.c.bf16 %v524_v8, %v524_v8  ;;  %v1166_v8 = vld [vmem:[%s1480_s3] sm:$0xff]  }
 0xd07   :  { %530 = vrot.lane.b32.xlu1 %v528_v9, %s1243_s13  ;;  %v1167_v9 = vld [vmem:[%s1480_s3 + $0x8] sm:$0xff]  }
 0xd79   :  { %v531_v10 = vpop.permute.xlu1 %530 }
 0xd7a   :  { %1105 = vmatmul.mubr.msk.bf16.vlgmr.msra.gmra.mrb[12].mxu1 %vm227_vm1, %v531_v10 }
 0xd7b   :  { %1117 = vmatpush3.bf16.msra.mxu1 %v1337_v41  ;;  %1120 = vmatprep.mubr.msk.bf16.mxu1 %vm1242_vm0, %v1241_v40 }
 0xd7c   :  { %1118 = vmatprep.subr.bf16.mxu1 %v1241_v40 }
 0xd7f   :  { %1119 = vmatpush3.bf16.msra.mxu1 %v1348_v42 }
 0xd80   :  { %1132 = vmatprep.subr.bf16.mxu1 %v1241_v40 }
 0xe4d   :  { %v569_v13 = vpop.f32.mrb[12].mxu1 }
 0xe4e   :  { %v575_v14 = vadd.f32 %v569_v13, %v527_v12  ;;  %v1106_v15 = vpop.f32.mrb[13].mxu1  ;;  %v1169_v12 = vld [vmem:[%s1481_s5 + $0x8] sm:$0xff]   ;;  %v1170_v13 = vld [vmem:[%s1481_s5 + $0x10] sm:$0xff]  }
 0xe4f   :  { %v572_v16 = vpop.f32.mrb[14].mxu1 }
 0xe50   :  { %1216 = vtanh.f32 %v575_v14  ;;  %v1107_v17 = vpop.f32.mrb[15].mxu1  ;;  %v958_v41 = vmul.f32 -1.442695, %v575_v14 }
 0xe51   :  { %v1171_v17 = vld [vmem:[%s1481_s5 + $0x18] sm:$0xff]  }
 0xe52   :  { %1218 = vpow2.f32 %v958_v41  ;;  %v1173_v41 = vld [vmem:[%s1481_s5 + $0x28] sm:$0xff]  }
 0xe5a   :  { %v1217_v18 = vpop.eup %1216 }
 0xe5b   :  { %585 = vrot.lane.b32.xlu0 %v1217_v18, %s1240_s0  ;;  %v1172_v18 = vld [vmem:[%s1481_s5 + $0x20] sm:$0xff]  }
 0xe5c   :  { %v1219_v19 = vpop.eup %1218 }
 0xe5d   :  { %v579_v20 = vadd.f32 1.0, %v1219_v19 }
 0xe5f   :  { %1220 = vrcp.f32 %v579_v20  ;;  %v1174_v20 = vld [vmem:[%s1481_s5 + $0x30] sm:$0xff]  }
 0xe69   :  { %v1221_v21 = vpop.eup %1220 }
 0xe6a   :  { %v583_v23 = vmul.f32 %v1221_v21, %v518_v5 }
 0xecd   :  { %v586_v42 = vpop.permute.xlu0 %585 }
 0xece   :  { %v588_v22 = vmul.f32 %v1221_v21, %v586_v42  ;;  %v963_v42 = vld [vmem:[%s1482_s4] ss:$0 sm:$0xff] }
 0xed0   :  { %590 = vrot.lane.b32.xlu1 %v588_v22, %s1240_s0 }
 0xf42   :  { %v591_v24 = vpop.permute.xlu1 %590 }
 0xf43   :  { %v593_v25 = vadd.f32 %v591_v24, %v583_v23 }
 0xf45   :  { %1222 = vtanh.f32 %v593_v25 }
 0xf4f   :  { %v1223_v26 = vpop.eup %1222 }
 0xf50   :  { %596 = vrot.lane.b32.xlu0 %v1223_v26, %s1240_s0 }
 0xfc2   :  { %v597_v27 = vpop.permute.xlu0 %596 }
 0xfc3   :  { %v599_v28 = vmul.f32 %v1221_v21, %v597_v27  ;;  %v1175_v21 = vld [vmem:[%s1481_s5 + $0x38] sm:$0xff]  }
 0xfc5   :  { %v603_v29 = vpack.c.bf16 %v599_v28, %v599_v28 }
 0xfc7   :  { %605 = vrot.lane.b32.xlu1 %v603_v29, %s1243_s13 }
0x1039   :  { %v606_v30 = vpop.permute.xlu1 %605 }
0x103a   :  { %1113 = vmatmul.mubr.msk.bf16.vlgmr.msra.gmra.mrb[12].mxu0 %vm227_vm1, %v606_v30 }
0x103b   :  { %1128 = vmatprep.mubr.msk.bf16.mxu0 %vm1242_vm0, %v1241_v40  ;;  %1125 = vmatpush3.bf16.msra.mxu0 %v1166_v8 }
0x103c   :  { %1126 = vmatprep.subr.bf16.mxu0 %v1241_v40 }
0x103f   :  { %1127 = vmatpush3.bf16.msra.mxu0 %v1167_v9 }
0x110d   :  { %v644_v32 = vpop.f32.mrb[12].mxu0 }
0x110e   :  { %v650_v33 = vadd.f32 %v644_v32, %v602_v31  ;;  %v1114_v34 = vpop.f32.mrb[13].mxu0 }
0x110f   :  { %v647_v35 = vpop.f32.mrb[14].mxu0 }
0x1110   :  { %1224 = vtanh.f32 %v650_v33  ;;  %v1115_v36 = vpop.f32.mrb[15].mxu0  ;;  %v960_v38 = vmul.f32 -1.442695, %v650_v33 }
0x1112   :  { %1226 = vpow2.f32 %v960_v38 }
0x111a   :  { %v1225_v37 = vpop.eup %1224 }
0x111b   :  { %660 = vrot.lane.b32.xlu0 %v1225_v37, %s1240_s0 }
0x111c   :  { %v1227_v39 = vpop.eup %1226 }
0x111d   :  { %v654_v43 = vadd.f32 1.0, %v1227_v39 }
0x111f   :  { %1228 = vrcp.f32 %v654_v43 }
0x1129   :  { %v1229_v44 = vpop.eup %1228 }
0x112a   :  { %v658_v47 = vmul.f32 %v1229_v44, %v593_v25 }
0x118d   :  { %v661_v45 = vpop.permute.xlu0 %660 }
0x118e   :  { %v663_v46 = vmul.f32 %v1229_v44, %v661_v45 }
0x1190   :  { %665 = vrot.lane.b32.xlu1 %v663_v46, %s1240_s0 }
0x1202   :  { %v666_v48 = vpop.permute.xlu1 %665 }
0x1203   :  { %v668_v49 = vadd.f32 %v666_v48, %v658_v47 }
0x1205   :  { %1230 = vtanh.f32 %v668_v49 }
0x120f   :  { %v1231_v50 = vpop.eup %1230 }
0x1210   :  { %671 = vrot.lane.b32.xlu0 %v1231_v50, %s1240_s0 }
0x1282   :  { %v672_v51 = vpop.permute.xlu0 %671 }
0x1283   :  { %v674_v52 = vmul.f32 %v1229_v44, %v672_v51 }
0x1285   :  { %v678_v53 = vpack.c.bf16 %v674_v52, %v674_v52 }
0x1287   :  { %680 = vrot.lane.b32.xlu1 %v678_v53, %s1243_s13 }
0x12f9   :  { %v681_v54 = vpop.permute.xlu1 %680 }
0x12fa   :  { %1121 = vmatmul.mubr.msk.bf16.vlgmr.msra.gmra.mrb[16].mxu1 %vm227_vm1, %v681_v54 }
0x12fb   :  { %1148 = vmatprep.mubr.msk.bf16.mxu1 %vm1242_vm0, %v1241_v40  ;;  %1133 = vmatpush3.bf16.msra.mxu1 %v1168_v11 }
0x12fc   :  { %1134 = vmatprep.subr.bf16.mxu1 %v1241_v40 }
0x12ff   :  { %1135 = vmatpush3.bf16.msra.mxu1 %v1169_v12 }
0x1300   :  { %1136 = vmatprep.subr.bf16.mxu1 %v1241_v40 }
0x1303   :  { %1137 = vmatpush3.bf16.msra.mxu1 %v1170_v13 }
0x1304   :  { %1138 = vmatprep.subr.bf16.mxu1 %v1241_v40 }
0x1307   :  { %1139 = vmatpush3.bf16.msra.mxu1 %v1171_v17 }
0x1308   :  { %1140 = vmatprep.subr.bf16.mxu1 %v1241_v40 }
0x130b   :  { %1141 = vmatpush3.bf16.msra.mxu1 %v1172_v18 }
0x130c   :  { %1142 = vmatprep.subr.bf16.mxu1 %v1241_v40 }
0x130f   :  { %1143 = vmatpush3.bf16.msra.mxu1 %v1173_v41 }
0x1310   :  { %1144 = vmatprep.subr.bf16.mxu1 %v1241_v40 }
0x1313   :  { %1145 = vmatpush3.bf16.msra.mxu1 %v1174_v20 }
0x1314   :  { %1146 = vmatprep.subr.bf16.mxu1 %v1241_v40  ;;  %v967_v40 = vld [vmem:[%s1483_s6] ss:$0 sm:$0xff] }
0x1317   :  { %1147 = vmatpush3.bf16.msra.mxu1 %v1175_v21 }
0x13cd   :  { %v719_v57 = vpop.f32.mrb[16].mxu1 }
0x13ce   :  { %v725_v58 = vadd.f32 %v719_v57, %v677_v56  ;;  %v1122_v59 = vpop.f32.mrb[17].mxu1 }
0x13cf   :  { %v722_v60 = vpop.f32.mrb[18].mxu1 }
0x13d0   :  { %1232 = vtanh.f32 %v725_v58  ;;  %v1123_v61 = vpop.f32.mrb[19].mxu1  ;;  %v962_v63 = vmul.f32 -1.442695, %v725_v58 }
0x13d2   :  { %1234 = vpow2.f32 %v962_v63 }
0x13da   :  { %v1233_v62 = vpop.eup %1232 }
0x13db   :  { %735 = vrot.lane.b32.xlu0 %v1233_v62, %s1240_s0 }
0x13dc   :  { %v1235_v0 = vpop.eup %1234 }
0x13dd   :  { %v729_v1 = vadd.f32 1.0, %v1235_v0 }
0x13df   :  { %1236 = vrcp.f32 %v729_v1 }
0x13e9   :  { %v1237_v2 = vpop.eup %1236 }
0x13ea   :  { %v733_v5 = vmul.f32 %v1237_v2, %v668_v49 }
0x144d   :  { %v736_v3 = vpop.permute.xlu0 %735 }
0x144e   :  { %v738_v4 = vmul.f32 %v1237_v2, %v736_v3 }
0x1450   :  { %740 = vrot.lane.b32.xlu1 %v738_v4, %s1240_s0 }
0x14c2   :  { %v741_v6 = vpop.permute.xlu1 %740 }
0x14c3   :  { %v743_v7 = vadd.f32 %v741_v6, %v733_v5 }
0x14c5   :  { %1238 = vtanh.f32 %v743_v7 }
0x14cf   :  { %v1239_v10 = vpop.eup %1238 }
0x14d0   :  { %746 = vrot.lane.b32.xlu0 %v1239_v10, %s1240_s0 }
0x1542   :  { %v747_v14 = vpop.permute.xlu0 %746 }
0x1543   :  { %v749_v15 = vmul.f32 %v1237_v2, %v747_v14 }
0x1545   :  { %v750_v16 = vpack.c.bf16 %v749_v15, %v749_v15 }
0x1547   :  { %763 = vrot.lane.b32.xlu1 %v750_v16, %s1243_s13 }
0x15b9   :  { %v764_v19 = vpop.permute.xlu1 %763 }
0x15ba   :  { %1129 = vmatmul.mubr.msk.bf16.vlgmr.msra.gmra.mrb[16].mxu0 %vm227_vm1, %v764_v19 }
0x168d   :  { %v814_v22 = vpop.f32.mrb[16].mxu0 }
0x168e   :  { %v815_v23 = vadd.f32 %v963_v42, %v814_v22  ;;  %v1130_v24 = vpop.f32.mrb[17].mxu0 }
0x168f   :  { %v817_v25 = vpop.f32.mrb[18].mxu0 }
0x1690   :  { %v820_v26 = vmax.f32 %v815_v23, 0.0  ;;  %v1131_v27 = vpop.f32.mrb[19].mxu0 }
0x1692   :  { %v821_v28 = vpack.c.bf16 %v820_v26, %v820_v26 }
0x1694   :  { %1149 = vmatmul.mubr.bf16.vlgmr.msra.gmra.mrb[20].mxu1 %v821_v28 }
0x1767   :  { %v927_v29 = vpop.f32.mrb[20].mxu1 }
0x1768   :  { %v928_v30 = vadd.f32 %v967_v40, %v927_v29  ;;  %v1150_v31 = vpop.f32.mrb[21].mxu1 }
0x1769   :  { %v930_v32 = vpop.f32.mrb[22].mxu1 }
0x176a   :  { %933 = vst [vmem:[%s1484_s7] sm:$0xff] %v928_v30  ;;  %v1151_v33 = vpop.f32.mrb[23].mxu1 }

</bundles_post_ra>
